<compile_context>
chip_gen: v7x
topology: tpu7x:2x2x1
jax: 0.10.0
libtpu: 0.0.40
codegen_flags: <defaults>
</compile_context>

<pallas_src>
import functools

import jax
import jax.numpy as jnp
from jax.experimental import pallas as pl
from jax.experimental.pallas import tpu as pltpu


def _sliding_window_sum(xp, k, out_len):
    """xp: (1, Lp, C) f32. Returns (1, out_len, C) with out[t] = sum_{i<k} xp[t+i].

    Binary-doubling decomposition: O(log k) shifted adds. All slice bounds are static.
    """
    if k == 1:
        return xp[:, :out_len, :]
    acc = None
    offset = 0
    p = 1
    s = xp  # invariant: s[:, t, :] = sum_{i<p} xp[:, t+i, :]
    kk = k
    while kk:
        if kk & 1:
            term = s[:, offset:offset + out_len, :]
            acc = term if acc is None else acc + term
            offset += p
        kk >>= 1
        if kk:
            valid = s.shape[1] - p
            s = s[:, :valid, :] + s[:, p:p + valid, :]
            p *= 2
    return acc


def _decomp_kernel(x_ref, res_ref, mean_ref, *, kernel_size: int):
    """Per (batch, channel-tile) block: x_ref (1, L, TC) -> res/mean (1, L, TC)."""
    k = kernel_size
    pad = (k - 1) // 2
    L = x_ref.shape[1]
    C = x_ref.shape[2]

    xf = x_ref[...].astype(jnp.float32)

    # Edge-replicated padding along time, built entirely in VMEM.
    if pad > 0:
        front = jnp.broadcast_to(xf[:, 0:1, :], (1, pad, C))
        back = jnp.broadcast_to(xf[:, L - 1:L, :], (1, pad, C))
        xp = jnp.concatenate([front, xf, back], axis=1)  # (1, L + k - 1, C)
    else:
        xp = xf

    mean = _sliding_window_sum(xp, k, L) * (1.0 / k)

    mean_ref[...] = mean.astype(mean_ref.dtype)
    res_ref[...] = (xf - mean).astype(res_ref.dtype)


def _choose_channel_tile(L, C, itemsize):
    """Pick a channel tile (multiple of 128 dividing C) targeting ~0.5 MiB input blocks."""
    if C % 128 != 0:
        return C  # cannot tile lanes cleanly; take the full channel dim
    target = 512 * 1024
    for tc in range(128, C + 1, 128):
        if C % tc:
            continue
        if L * tc * itemsize >= target:
            return tc
    return C


def series_decomp(x: jax.Array, kernel_size: int, *, channel_tile: int | None = None):
    """Series decomposition: returns (res, moving_mean), both shaped like x = [B, L, C]."""
    assert kernel_size % 2 == 1, "kernel_size must be odd to preserve sequence length"
    B, L, C = x.shape
    itemsize = x.dtype.itemsize

    tc = channel_tile if channel_tile is not None else _choose_channel_tile(L, C, itemsize)
    assert C % tc == 0, "channel tile must divide C"
    n_c = C // tc

    kernel = functools.partial(_decomp_kernel, kernel_size=kernel_size)

    # Advisory cost: HBM-bandwidth-bound (1 read, 2 writes), ~O(log K) adds per element.
    bytes_accessed = 3 * B * L * C * itemsize
    flops = (2 * kernel_size.bit_length() + 2) * B * L * C
    cost = pl.CostEstimate(flops=flops, transcendentals=0, bytes_accessed=bytes_accessed)

    # VMEM budget: double-buffered input + two double-buffered outputs + f32 temporaries.
    blk = L * tc * itemsize
    f32_tmp = (L + kernel_size - 1) * tc * 4
    vmem_est = 6 * blk + 8 * f32_tmp
    vmem_limit = int(min(64 * 1024 * 1024, max(32 * 1024 * 1024, 2 * vmem_est)))

    res, mean = pl.pallas_call(
        kernel,
        out_shape=(
            jax.ShapeDtypeStruct((B, L, C), x.dtype),
            jax.ShapeDtypeStruct((B, L, C), x.dtype),
        ),
        grid_spec=pltpu.PrefetchScalarGridSpec(
            num_scalar_prefetch=0,
            grid=(B, n_c),
            in_specs=[pl.BlockSpec((1, L, tc), lambda b, c: (b, 0, c))],
            out_specs=(
                pl.BlockSpec((1, L, tc), lambda b, c: (b, 0, c)),
                pl.BlockSpec((1, L, tc), lambda b, c: (b, 0, c)),
            ),
        ),
        compiler_params=pltpu.CompilerParams(
            dimension_semantics=("parallel", "parallel"),
            vmem_limit_bytes=vmem_limit,
        ),
        cost_estimate=cost,
    )(x)
    return res, mean


def _reference(x, kernel_size):
    """Pure-JAX reference mirroring the PyTorch semantics (AvgPool1d stride=1 + edge pad)."""
    pad = (kernel_size - 1) // 2
    xpad = jnp.concatenate(
        [jnp.repeat(x[:, 0:1, :], pad, axis=1), x, jnp.repeat(x[:, -1:, :], pad, axis=1)],
        axis=1,
    )
    L = x.shape[1]
    mean = jnp.stack(
        [xpad[:, i:i + kernel_size, :].mean(axis=1) for i in range(L)], axis=1
    )
    return x - mean, mean


if __name__ == "__main__":
    key = jax.random.PRNGKey(0)
    k1, k2, k3 = jax.random.split(key, 3)

    # Case 1: raw-feature-like config (C not a multiple of 128 -> single channel tile).
    B, L, C, K = 2, 16, 8, 5
    x = jax.random.normal(k1, (B, L, C), dtype=jnp.float32)
    res, mean = series_decomp(x, K)
    jax.block_until_ready((res, mean))
    res_ref, mean_ref = _reference(x, K)
    assert jnp.allclose(res, res_ref, atol=1e-5, rtol=1e-5)
    assert jnp.allclose(mean, mean_ref, atol=1e-5, rtol=1e-5)

    # Case 2: d_model-like config exercising channel tiling + Quatformer's kernel_size=25.
    B2, L2, C2, K2 = 2, 32, 256, 25
    x2 = jax.random.normal(k2, (B2, L2, C2), dtype=jnp.float32)
    res2, mean2 = series_decomp(x2, K2, channel_tile=128)
    jax.block_until_ready((res2, mean2))
    res2_ref, mean2_ref = _reference(x2, K2)
    assert jnp.allclose(res2, res2_ref, atol=1e-5, rtol=1e-5)
    assert jnp.allclose(mean2, mean2_ref, atol=1e-5, rtol=1e-5)

    # Case 3: bf16 input stays narrow in HBM; f32 accumulation in VMEM.
    x3 = jax.random.normal(k3, (2, 24, 128), dtype=jnp.bfloat16)
    res3, mean3 = series_decomp(x3, 7)
    jax.block_until_ready((res3, mean3))
    res3_ref, mean3_ref = _reference(x3.astype(jnp.float32), 7)
    assert jnp.allclose(res3.astype(jnp.float32), res3_ref, atol=2e-2, rtol=2e-2)
    assert jnp.allclose(mean3.astype(jnp.float32), mean3_ref, atol=2e-2, rtol=2e-2)

    print("KERNEL_OK")
</pallas_src>

<mosaic_0001>
module attributes {stable_mosaic.version = 11 : i64} {
  func.func @_decomp_kernel(%arg0: i32, %arg1: i32, %arg2: memref<1x16x8xf32, #tpu.memory_space<vmem>>, %arg3: memref<1x16x8xf32, #tpu.memory_space<vmem>>, %arg4: memref<1x16x8xf32, #tpu.memory_space<vmem>>) attributes {dimension_semantics = [#tpu.dimension_semantics<parallel>, #tpu.dimension_semantics<parallel>], iteration_bounds = array<i64: 2, 1>, scalar_prefetch = 0 : i64, scratch_operands = 0 : i64, tpu.core_type = #tpu.core_type<tc>, window_params = [{transform_indices = @transform_0, window_bounds = array<i64: 1, 16, 8>}, {transform_indices = @transform_1, window_bounds = array<i64: 1, 16, 8>}, {transform_indices = @transform_2, window_bounds = array<i64: 1, 16, 8>}]} {
    %c0 = arith.constant 0 : index
    %c0_0 = arith.constant 0 : index
    %c0_1 = arith.constant 0 : index
    %0 = vector.load %arg2[%c0, %c0_0, %c0_1] : memref<1x16x8xf32, #tpu.memory_space<vmem>>, vector<1x16x8xf32>
    %1 = vector.extract_strided_slice %0 {offsets = [0, 0, 0], sizes = [1, 1, 8], strides = [1, 1, 1]} : vector<1x16x8xf32> to vector<1x1x8xf32>
    %2 = vector.shape_cast %1 : vector<1x1x8xf32> to vector<1x1x8xf32>
    %3 = vector.broadcast %2 : vector<1x1x8xf32> to vector<1x2x8xf32>
    %4 = vector.extract_strided_slice %0 {offsets = [0, 15, 0], sizes = [1, 1, 8], strides = [1, 1, 1]} : vector<1x16x8xf32> to vector<1x1x8xf32>
    %5 = vector.shape_cast %4 : vector<1x1x8xf32> to vector<1x1x8xf32>
    %6 = vector.broadcast %5 : vector<1x1x8xf32> to vector<1x2x8xf32>
    %7 = tpu.concatenate %3, %0, %6 in 1 : vector<1x2x8xf32>, vector<1x16x8xf32>, vector<1x2x8xf32> -> vector<1x20x8xf32>
    %8 = vector.extract_strided_slice %7 {offsets = [0, 0, 0], sizes = [1, 16, 8], strides = [1, 1, 1]} : vector<1x20x8xf32> to vector<1x16x8xf32>
    %9 = vector.extract_strided_slice %7 {offsets = [0, 0, 0], sizes = [1, 19, 8], strides = [1, 1, 1]} : vector<1x20x8xf32> to vector<1x19x8xf32>
    %10 = vector.extract_strided_slice %7 {offsets = [0, 1, 0], sizes = [1, 19, 8], strides = [1, 1, 1]} : vector<1x20x8xf32> to vector<1x19x8xf32>
    %11 = arith.addf %9, %10 : vector<1x19x8xf32>
    %12 = vector.extract_strided_slice %11 {offsets = [0, 0, 0], sizes = [1, 17, 8], strides = [1, 1, 1]} : vector<1x19x8xf32> to vector<1x17x8xf32>
    %13 = vector.extract_strided_slice %11 {offsets = [0, 2, 0], sizes = [1, 17, 8], strides = [1, 1, 1]} : vector<1x19x8xf32> to vector<1x17x8xf32>
    %14 = arith.addf %12, %13 : vector<1x17x8xf32>
    %15 = vector.extract_strided_slice %14 {offsets = [0, 1, 0], sizes = [1, 16, 8], strides = [1, 1, 1]} : vector<1x17x8xf32> to vector<1x16x8xf32>
    %16 = arith.addf %8, %15 : vector<1x16x8xf32>
    %cst = arith.constant 2.000000e-01 : f32
    %17 = vector.broadcast %cst : f32 to vector<1x16x8xf32>
    %18 = arith.mulf %16, %17 : vector<1x16x8xf32>
    %c0_2 = arith.constant 0 : index
    %c0_3 = arith.constant 0 : index
    %c0_4 = arith.constant 0 : index
    %19 = vector.load %arg4[%c0_2, %c0_3, %c0_4] : memref<1x16x8xf32, #tpu.memory_space<vmem>>, vector<1x16x8xf32>
    tpu.vector_store %arg4[%c0_2, %c0_3, %c0_4], %18 {strides = array<i32>} : memref<1x16x8xf32, #tpu.memory_space<vmem>>, vector<1x16x8xf32>,
    %20 = arith.subf %0, %18 : vector<1x16x8xf32>
    %c0_5 = arith.constant 0 : index
    %c0_6 = arith.constant 0 : index
    %c0_7 = arith.constant 0 : index
    %21 = vector.load %arg3[%c0_5, %c0_6, %c0_7] : memref<1x16x8xf32, #tpu.memory_space<vmem>>, vector<1x16x8xf32>
    tpu.vector_store %arg3[%c0_5, %c0_6, %c0_7], %20 {strides = array<i32>} : memref<1x16x8xf32, #tpu.memory_space<vmem>>, vector<1x16x8xf32>,
    return
  }
  func.func @transform_0(%arg0: i32, %arg1: i32) -> (i32, i32, i32) {
    %c0_i32 = arith.constant 0 : i32
    %c0_i32_0 = arith.constant 0 : i32
    return %arg0, %c0_i32, %arg1 : i32, i32, i32
  }
  func.func @transform_1(%arg0: i32, %arg1: i32) -> (i32, i32, i32) {
    %c0_i32 = arith.constant 0 : i32
    %c0_i32_0 = arith.constant 0 : i32
    return %arg0, %c0_i32, %arg1 : i32, i32, i32
  }
  func.func @transform_2(%arg0: i32, %arg1: i32) -> (i32, i32, i32) {
    %c0_i32 = arith.constant 0 : i32
    %c0_i32_0 = arith.constant 0 : i32
    return %arg0, %c0_i32, %arg1 : i32, i32, i32
  }
}

</mosaic_0001>

<bundles_post_ra>
// kernel: tpu_custom_call.1
= control target key start
LH: loop header
LB: loop body
LE: loop exit
PB: predicated region body
PF: predicated region fallthrough
CT: control target
= control target key end

     0   :  { %s476_s9 = smov 0   ;;  %s478_s10 = smov 0   ;;  %s521_s0 = inlined_call_operand.vmem [shape: f32[2,16,8], index: 0, kind: input, shape index: {}]   ;;  %s522_s1 = inlined_call_operand.vmem [shape: f32[2,16,8], index: 1, kind: output, shape index: {0}]   ;;  %s523_s2 = inlined_call_operand.vmem [shape: f32[2,16,8], index: 2, kind: output, shape index: {1}]  }
   0x1   :  { %s480_s11 = smov 0  }
   0x2 LB: > { %s25_s12 = sadd.s32 1, %s455_s10  ;;  %p401_p0 = scmp.ge.s32.totalorder %s459_s11, 1  ;;  %s459_s11 = sphi %s480_s11, %s13_s11   ;;  %s455_s10 = sphi %s478_s10, %s525_s10   ;;  %s451_s9 = sphi %s476_s9, %s524_s9  }
   0x3   : > { %p27_p1 = scmp.ge.s32.totalorder %s25_s12, 2  ;;  %p136_p2 = scmp.lt.s32.totalorder %s459_s11, 3 }
   0x5   : > { %s527_s12 = smov (%p27_p1, %s25_s12), 0  ;;  %p137_p3 = pnand %p401_p0, %p136_p2 }
   0x6   : > { %p172_p4 = scmp.lt.s32.totalorder (!%p137_p3), %s451_s9, 1  ;;  %v198_v0 = vlaneseq (!%p137_p3)  ;;  %vm208_vm0 = vcmask (!%p137_p3), 1041408   ;;  %vm219_vm1 = vcmask (!%p137_p3), 1046528   ;;  %vm234_vm2 = vcmask (!%p137_p3), 1045504  }
   0x7   : > { %140 = sbr.rel (%p137_p3) target bundleno = 41 (0x29), region = 24  ;;  %vm260_vm3 = vcmask (!%p137_p3), 64512  }
   0x8   : > { %v199_v1 = vshrl.u32 (!%p137_p3), %v198_v0, 7 }
   0xa   : > { %v200_v2 = vsub.s32 (!%p137_p3), 0, %v199_v1  ;;  %v204_v3 = vsub.s32 (!%p137_p3), 7, %v199_v1 }
   0xe   : > { %s529_s9 = smov (!%p172_p4, %s451_s9), 1 }
   0xf   : > { %s494_s13 = sshll.u32 %s529_s9, 4 }
  0x10   : > { %s179_s16 = scalar_lea.vmem %s521_s0, %s494_s13  ;;  %s195_s19 = scalar_lea.vmem %s523_s2, %s494_s13 }
  0x11   : > { %v196_v4 = vld [vmem:[%s179_s16] sm:$0xff]  ;;  %v197_v5 = vld [vmem:[%s179_s16 + $0x8] sm:$0xff]  ;;  %s187_s22 = scalar_lea.vmem %s522_s1, %s494_s13 }
  0x12   : > { %v201_v6 = vrot.slane %v196_v4, %v200_v2  ;;  %v205_v7 = vrot.slane %v197_v5, %v204_v3  ;;  %v209_v8 = vrot.slane %v196_v4, 6  ;;  %v210_v9 = vrot.slane %v197_v5, 6 }
  0x14   : > { %v211_v10 = vsel %vm208_vm0, %v209_v8, %v210_v9  ;;  %v215_v11 = vsel %vm208_vm0, %v201_v6, %v209_v8  ;;  %v216_v12 = vsel %vm208_vm0, %v210_v9, %v205_v7 }
  0x15   : > { %v220_v13 = vrot.slane %v215_v11, 1  ;;  %v221_v14 = vrot.slane %v211_v10, 1  ;;  %v223_v15 = vrot.slane %v216_v12, 1 }
  0x17   : > { %v222_v16 = vsel %vm219_vm1, %v220_v13, %v221_v14  ;;  %v224_v17 = vsel %vm219_vm1, %v221_v14, %v223_v15  ;;  %v230_v18 = vadd.f32 %v223_v15, %v216_v12 }
  0x18   : > { %v228_v19 = vadd.f32 %v222_v16, %v215_v11  ;;  %v229_v20 = vadd.f32 %v224_v17, %v211_v10 }
  0x19   : > { %v238_v21 = vrot.slane %v230_v18, 2 }
  0x1a   : > { %v235_v22 = vrot.slane %v228_v19, 2  ;;  %v236_v23 = vrot.slane %v229_v20, 2 }
  0x1b   : > { %v245_v24 = vadd.f32 %v238_v21, %v230_v18 }
  0x1c   : > { %v237_v25 = vsel %vm234_vm2, %v235_v22, %v236_v23  ;;  %v239_v26 = vsel %vm234_vm2, %v236_v23, %v238_v21 }
  0x1d   : > { %v243_v27 = vadd.f32 %v237_v25, %v228_v19  ;;  %v244_v28 = vadd.f32 %v239_v26, %v229_v20  ;;  %v252_v29 = vrot.slane %v245_v24, 1 }
  0x1f   : > { %v249_v30 = vrot.slane %v243_v27, 1  ;;  %v250_v31 = vrot.slane %v244_v28, 1 }
  0x21   : > { %v251_v32 = vsel %vm219_vm1, %v249_v30, %v250_v31  ;;  %v253_v33 = vsel %vm219_vm1, %v250_v31, %v252_v29 }
  0x22   : > { %v256_v34 = vadd.f32 %v251_v32, %v215_v11  ;;  %v257_v35 = vadd.f32 %v253_v33, %v211_v10 }
  0x24   : > { %v258_v36 = vmul.f32 0.2, %v256_v34  ;;  %v259_v37 = vmul.f32 0.2, %v257_v35 }
  0x26   : > { %261 = vst.msk [vmem:[%s195_s19] sm:$0xff] %vm260_vm3, %v258_v36  ;;  %262 = vst.msk [vmem:[%s195_s19 + $0x8] sm:$0xff] %vm260_vm3, %v259_v37  ;;  %v263_v38 = vsub.f32 %v196_v4, %v258_v36  ;;  %v264_v39 = vsub.f32 %v197_v5, %v259_v37 }
  0x28   : > { %265 = vst.msk [vmem:[%s187_s22] sm:$0xff] %vm260_vm3, %v263_v38  ;;  %266 = vst.msk [vmem:[%s187_s22 + $0x8] sm:$0xff] %vm260_vm3, %v264_v39 }
  0x29 PF: > { %s13_s11 = sadd.s32 1, %s459_s11   ;;  %s524_s9 = smov %s455_s10 }
  0x2a   : > { %p10_p5 = scmp.ge.s32.totalorder %s13_s11, 4   ;;  %s525_s10 = smov %s527_s12 }
  0x2c   :  { %12 = sbr.rel (!%p10_p5) target bundleno = 2 (0x2), region = 66 }

</bundles_post_ra>
